<compile_context>
chip_gen: v5e
topology: v5e:2x2
jax: 0.10.0
libtpu: 0.0.40
codegen_flags: <defaults>
</compile_context>

<pallas_src>
import math

import jax
import jax.numpy as jnp
from jax.experimental import pallas as pl
from jax.experimental.pallas import tpu as pltpu


def _round_up(n, m):
    return ((n + m - 1) // m) * m


def soft_q_kernel(xa_ref, w1_ref, b1_ref, w2_ref, b2_ref, w3_ref, b3_ref, o_ref):
    # fc1: single bf16 matmul (concat + K-pad already done in the wrapper), f32 accumulate.
    h1 = jnp.dot(xa_ref[...], w1_ref[...], preferred_element_type=jnp.float32)
    h1 = jnp.maximum(h1 + b1_ref[...], 0.0)                      # f32 on the VPU

    # fc2: bf16 operands, f32 accumulate.
    h2 = jnp.dot(h1.astype(jnp.bfloat16), w2_ref[...],
                 preferred_element_type=jnp.float32)
    h2 = jnp.maximum(h2 + b2_ref[...], 0.0)                      # f32 on the VPU

    # fc3 (out_features == 1): VPU multiply + lane reduction, f32, scalar bias from SMEM.
    q = jnp.sum(h2 * w3_ref[...], axis=-1, keepdims=True) + b3_ref[0, 0]
    o_ref[...] = q.astype(o_ref.dtype)


def _soft_q_ref(x, a, params):
    """Pure-JAX forward mirroring the kernel's math (bf16 dot operands, f32 accumulate)."""
    w1, b1, w2, b2, w3, b3 = params
    d_in = x.shape[1] + a.shape[1]
    xa = jnp.concatenate([x.astype(jnp.float32), a.astype(jnp.float32)], axis=1)
    xa = jnp.pad(xa, ((0, 0), (0, w1.shape[0] - d_in))).astype(jnp.bfloat16)
    h1 = jnp.maximum(jnp.dot(xa, w1, preferred_element_type=jnp.float32) + b1, 0.0)
    h2 = jnp.maximum(
        jnp.dot(h1.astype(jnp.bfloat16), w2, preferred_element_type=jnp.float32) + b2, 0.0)
    return jnp.sum(h2 * w3, axis=-1, keepdims=True) + b3[0, 0]


def soft_q_forward(x, a, params, *, max_tile_b=512, min_pallas_batch=64):
    """x: (B, d_obs), a: (B, d_act) -> (B, 1) f32 Q-values."""
    x = x.astype(jnp.float32)
    a = a.astype(jnp.float32)
    B, d_obs = x.shape
    d_act = a.shape[1]
    w1, b1, w2, b2, w3, b3 = params
    d_in_pad = w1.shape[0]          # round_up(d_obs + d_act, 16)
    h1_dim = w1.shape[1]            # 256
    h2_dim = w2.shape[1]            # 128

    # Small-batch bypass: launch + resident-weight DMA overhead dominates; XLA's fused
    # tiny GEMMs are as fast, and this keeps the kernel tuned for the training batch.
    if B < min_pallas_batch:
        return _soft_q_ref(x, a, params)

    # Batch tiling: >= 2 grid steps so both v7x TensorCores get work on the "parallel"
    # axis; tile sized so padding waste is < one 16-row sublane tile per step; tiles
    # capped at max_tile_b so per-step compute dwarfs the ~0.35 us step overhead.
    n_steps = max(2, pl.cdiv(B, max_tile_b))
    tile_b = _round_up(pl.cdiv(B, n_steps), 16)   # 16: bf16 sublane packing
    B_pad = n_steps * tile_b

    # One fused XLA op: concat + K-pad + batch-pad + cast to bf16 (the kernel's LHS).
    xa = jnp.concatenate([x, a], axis=1)
    xa = jnp.pad(xa, ((0, B_pad - B), (0, d_in_pad - (d_obs + d_act))))
    xa = xa.astype(jnp.bfloat16)

    out = pl.pallas_call(
        soft_q_kernel,
        out_shape=jax.ShapeDtypeStruct((B_pad, 1), jnp.float32),
        grid=(n_steps,),
        in_specs=[
            pl.BlockSpec((tile_b, d_in_pad), lambda i: (i, 0)),   # xa tile (bf16)
            pl.BlockSpec((d_in_pad, h1_dim), lambda i: (0, 0)),   # w1 (bf16, VMEM-resident)
            pl.BlockSpec((1, h1_dim), lambda i: (0, 0)),          # b1 (f32, resident)
            pl.BlockSpec((h1_dim, h2_dim), lambda i: (0, 0)),     # w2 (bf16, resident)
            pl.BlockSpec((1, h2_dim), lambda i: (0, 0)),          # b2 (f32, resident)
            pl.BlockSpec((1, h2_dim), lambda i: (0, 0)),          # w3 row (f32, resident)
            pl.BlockSpec(memory_space=pltpu.MemorySpace.SMEM),    # b3 scalar in SMEM
        ],
        out_specs=pl.BlockSpec((tile_b, 1), lambda i: (i, 0)),
        compiler_params=pltpu.CompilerParams(
            dimension_semantics=("parallel",)),
    )(xa, w1, b1, w2, b2, w3, b3)

    return out[:B]


def xavier_uniform(key, fan_in, fan_out, gain=1.0):
    # torch.nn.init.xavier_uniform_: U(-a, a), a = gain * sqrt(6 / (fan_in + fan_out)).
    # (in, out) layout so the kernel computes x @ W directly (== x @ W_pt.T).
    bound = gain * math.sqrt(6.0 / (fan_in + fan_out))
    return jax.random.uniform(key, (fan_in, fan_out), dtype=jnp.float32,
                              minval=-bound, maxval=bound)


def init_params(key, input_shape, output_shape):
    k1, k2, k3 = jax.random.split(key, 3)
    d_in = input_shape + output_shape
    d_in_pad = _round_up(d_in, 16)
    # fc1: xavier over the true (d_in, 256) fan-in (matches PyTorch), then zero-pad the K
    # rows to the bf16 sublane tile and cast; the zero rows contribute nothing to the dot.
    w1 = xavier_uniform(k1, d_in, 256)
    w1 = jnp.pad(w1, ((0, d_in_pad - d_in), (0, 0))).astype(jnp.bfloat16)
    b1 = jnp.zeros((1, 256), jnp.float32)          # bias_init == 'zeros'
    w2 = xavier_uniform(k2, 256, 128).astype(jnp.bfloat16)
    b2 = jnp.zeros((1, 128), jnp.float32)
    # fc3 weight stored as a (1, 128) f32 row vector for the VPU reduction epilogue.
    w3 = xavier_uniform(k3, 128, 1).reshape(1, 128)
    b3 = jnp.zeros((1, 1), jnp.float32)
    return (w1, b1, w2, b2, w3, b3)


if __name__ == "__main__":
    key = jax.random.PRNGKey(0)
    k_obs, k_act, k_params = jax.random.split(key, 3)

    input_shape = 16   # env.observation_space.shape[0]
    output_shape = 6   # env.action_space.shape[0]
    params = init_params(k_params, input_shape, output_shape)

    # Batch large enough to take the Pallas path, and ragged on purpose:
    # B=200 -> 2 grid steps of tile_b=112 rows, 24 padded rows sliced off at the end.
    batch = 200
    x = jax.random.normal(k_obs, (batch, input_shape), dtype=jnp.float32)
    a = jax.random.normal(k_act, (batch, output_shape), dtype=jnp.float32)

    out = soft_q_forward(x, a, params)
    jax.block_until_ready(out)
    assert out.shape == (batch, 1)

    # Reference mirrors the kernel's bf16-operand / f32-accumulate math exactly.
    ref = _soft_q_ref(x, a, params)
    assert jnp.allclose(out, ref, atol=1e-3, rtol=1e-3), \
        float(jnp.max(jnp.abs(out - ref)))

    # Small-batch bypass path (pure JAX fallback) sanity check.
    out_small = soft_q_forward(x[:2], a[:2], params)
    jax.block_until_ready(out_small)
    assert out_small.shape == (2, 1)
    assert jnp.allclose(out_small, ref[:2], atol=1e-3, rtol=1e-3)

    print("KERNEL_OK")
</pallas_src>

<mosaic_0001>
module attributes {stable_mosaic.version = 11 : i64} {
  func.func @soft_q_kernel(%arg0: i32, %arg1: memref<112x32xbf16, #tpu.memory_space<vmem>>, %arg2: memref<32x256xbf16, #tpu.memory_space<vmem>>, %arg3: memref<1x256xf32, #tpu.memory_space<vmem>>, %arg4: memref<256x128xbf16, #tpu.memory_space<vmem>>, %arg5: memref<1x128xf32, #tpu.memory_space<vmem>>, %arg6: memref<1x128xf32, #tpu.memory_space<vmem>>, %arg7: memref<1x1xf32, #tpu.memory_space<smem>>, %arg8: memref<112x1xf32, #tpu.memory_space<vmem>>) attributes {dimension_semantics = [#tpu.dimension_semantics<parallel>], iteration_bounds = array<i64: 2>, scalar_prefetch = 0 : i64, scratch_operands = 0 : i64, tpu.core_type = #tpu.core_type<tc>, window_params = [{transform_indices = @transform_0, window_bounds = array<i64: 112, 32>}, {pipeline_mode = #tpu.pipeline_mode<synchronous>, transform_indices = @transform_1, window_bounds = array<i64: 32, 256>}, {pipeline_mode = #tpu.pipeline_mode<synchronous>, transform_indices = @transform_2, window_bounds = array<i64: 1, 256>}, {pipeline_mode = #tpu.pipeline_mode<synchronous>, transform_indices = @transform_3, window_bounds = array<i64: 256, 128>}, {pipeline_mode = #tpu.pipeline_mode<synchronous>, transform_indices = @transform_4, window_bounds = array<i64: 1, 128>}, {pipeline_mode = #tpu.pipeline_mode<synchronous>, transform_indices = @transform_5, window_bounds = array<i64: 1, 128>}, {transform_indices = @transform_6, window_bounds = array<i64: 1, 1>}, {transform_indices = @transform_7, window_bounds = array<i64: 112, 1>}]} {
    %c0 = arith.constant 0 : index
    %c0_0 = arith.constant 0 : index
    %0 = vector.load %arg1[%c0, %c0_0] : memref<112x32xbf16, #tpu.memory_space<vmem>>, vector<112x32xbf16>
    %c0_1 = arith.constant 0 : index
    %c0_2 = arith.constant 0 : index
    %1 = vector.load %arg2[%c0_1, %c0_2] : memref<32x256xbf16, #tpu.memory_space<vmem>>, vector<32x256xbf16>
    %cst = arith.constant dense<0.000000e+00> : vector<112x256xf32>
    %2 = tpu.matmul %0, %1, %cst {dimension_numbers = #tpu.dot_dimension_numbers<[1], [0], [0], [1], [0, 0, 1, 1], [], []>} : vector<112x32xbf16>, vector<32x256xbf16>, vector<112x256xf32> -> vector<112x256xf32>
    %c0_3 = arith.constant 0 : index
    %c0_4 = arith.constant 0 : index
    %3 = vector.load %arg3[%c0_3, %c0_4] : memref<1x256xf32, #tpu.memory_space<vmem>>, vector<1x256xf32>
    %4 = vector.broadcast %3 : vector<1x256xf32> to vector<112x256xf32>
    %5 = arith.addf %2, %4 : vector<112x256xf32>
    %cst_5 = arith.constant 0.000000e+00 : f32
    %6 = vector.broadcast %cst_5 : f32 to vector<112x256xf32>
    %7 = arith.maximumf %5, %6 : vector<112x256xf32>
    %8 = arith.truncf %7 : vector<112x256xf32> to vector<112x256xbf16>
    %c0_6 = arith.constant 0 : index
    %c0_7 = arith.constant 0 : index
    %9 = vector.load %arg4[%c0_6, %c0_7] : memref<256x128xbf16, #tpu.memory_space<vmem>>, vector<256x128xbf16>
    %cst_8 = arith.constant dense<0.000000e+00> : vector<112x128xf32>
    %10 = tpu.matmul %8, %9, %cst_8 {dimension_numbers = #tpu.dot_dimension_numbers<[1], [0], [0], [1], [0, 0, 1, 1], [], []>} : vector<112x256xbf16>, vector<256x128xbf16>, vector<112x128xf32> -> vector<112x128xf32>
    %c0_9 = arith.constant 0 : index
    %c0_10 = arith.constant 0 : index
    %11 = vector.load %arg5[%c0_9, %c0_10] : memref<1x128xf32, #tpu.memory_space<vmem>>, vector<1x128xf32>
    %12 = vector.broadcast %11 : vector<1x128xf32> to vector<112x128xf32>
    %13 = arith.addf %10, %12 : vector<112x128xf32>
    %cst_11 = arith.constant 0.000000e+00 : f32
    %14 = vector.broadcast %cst_11 : f32 to vector<112x128xf32>
    %15 = arith.maximumf %13, %14 : vector<112x128xf32>
    %c0_12 = arith.constant 0 : index
    %c0_13 = arith.constant 0 : index
    %16 = vector.load %arg6[%c0_12, %c0_13] : memref<1x128xf32, #tpu.memory_space<vmem>>, vector<1x128xf32>
    %17 = vector.broadcast %16 : vector<1x128xf32> to vector<112x128xf32>
    %18 = arith.mulf %15, %17 : vector<112x128xf32>
    %cst_14 = arith.constant dense<0.000000e+00> : vector<112xf32>
    %19 = vector.multi_reduction <add>, %18, %cst_14 [1] : vector<112x128xf32> to vector<112xf32>
    %20 = vector.shape_cast %19 : vector<112xf32> to vector<112x1xf32>
    %c0_15 = arith.constant 0 : index
    %c0_16 = arith.constant 0 : index
    %21 = memref.load %arg7[%c0_15, %c0_16] : memref<1x1xf32, #tpu.memory_space<smem>>
    %22 = vector.broadcast %21 : f32 to vector<112x1xf32>
    %23 = arith.addf %20, %22 : vector<112x1xf32>
    %c0_17 = arith.constant 0 : index
    %c0_18 = arith.constant 0 : index
    %24 = vector.load %arg8[%c0_17, %c0_18] : memref<112x1xf32, #tpu.memory_space<vmem>>, vector<112x1xf32>
    tpu.vector_store %arg8[%c0_17, %c0_18], %23 {strides = array<i32>} : memref<112x1xf32, #tpu.memory_space<vmem>>, vector<112x1xf32>,
    return
  }
  func.func @transform_0(%arg0: i32) -> (i32, i32) {
    %c0_i32 = arith.constant 0 : i32
    %c0_i32_0 = arith.constant 0 : i32
    return %arg0, %c0_i32 : i32, i32
  }
  func.func @transform_1(%arg0: i32) -> (i32, i32) {
    %c0_i32 = arith.constant 0 : i32
    %c0_i32_0 = arith.constant 0 : i32
    %c0_i32_1 = arith.constant 0 : i32
    return %c0_i32, %c0_i32_0 : i32, i32
  }
  func.func @transform_2(%arg0: i32) -> (i32, i32) {
    %c0_i32 = arith.constant 0 : i32
    %c0_i32_0 = arith.constant 0 : i32
    %c0_i32_1 = arith.constant 0 : i32
    return %c0_i32, %c0_i32_0 : i32, i32
  }
  func.func @transform_3(%arg0: i32) -> (i32, i32) {
    %c0_i32 = arith.constant 0 : i32
    %c0_i32_0 = arith.constant 0 : i32
    %c0_i32_1 = arith.constant 0 : i32
    return %c0_i32, %c0_i32_0 : i32, i32
  }
  func.func @transform_4(%arg0: i32) -> (i32, i32) {
    %c0_i32 = arith.constant 0 : i32
    %c0_i32_0 = arith.constant 0 : i32
    %c0_i32_1 = arith.constant 0 : i32
    return %c0_i32, %c0_i32_0 : i32, i32
  }
  func.func @transform_5(%arg0: i32) -> (i32, i32) {
    %c0_i32 = arith.constant 0 : i32
    %c0_i32_0 = arith.constant 0 : i32
    %c0_i32_1 = arith.constant 0 : i32
    return %c0_i32, %c0_i32_0 : i32, i32
  }
  func.func @transform_6(%arg0: i32) -> (i32, i32) {
    %c0_i32 = arith.constant 0 : i32
    %c0_i32_0 = arith.constant 0 : i32
    %c0_i32_1 = arith.constant 0 : i32
    return %c0_i32, %c0_i32_0 : i32, i32
  }
  func.func @transform_7(%arg0: i32) -> (i32, i32) {
    %c0_i32 = arith.constant 0 : i32
    %c0_i32_0 = arith.constant 0 : i32
    return %arg0, %c0_i32 : i32, i32
  }
}

</mosaic_0001>

<bundles_post_ra>
// kernel: tpu_custom_call.1
= control target key start
LH: loop header
LB: loop body
LE: loop exit
PB: predicated region body
PF: predicated region fallthrough
CT: control target
= control target key end

     0   :  { %s1380_s0 = inlined_call_operand.vmem [shape: bf16[224,32], index: 0, kind: input, shape index: {}]   ;;  %s1381_s1 = inlined_call_operand.hbm [shape: bf16[32,256], index: 1, kind: input, shape index: {}]   ;;  %s1382_s2 = inlined_call_operand.vmem [shape: f32[1,256], index: 2, kind: input, shape index: {}]   ;;  %s1383_s3 = inlined_call_operand.vmem [shape: bf16[256,128], index: 3, kind: input, shape index: {}]   ;;  %s1384_s4 = inlined_call_operand.vmem [shape: f32[1,128], index: 4, kind: input, shape index: {}]   ;;  %s1385_s5 = inlined_call_operand.vmem [shape: f32[1,128], index: 5, kind: input, shape index: {}]   ;;  %s1386_s6 = inlined_call_operand.<no memory space> [shape: f32[1,1], index: 6, kind: input, shape index: {}]   ;;  %s1387_s7 = inlined_call_operand.vmem [shape: f32[224,1], index: 7, kind: output, shape index: {}]  }
   0x1   :  { %12 = sst [smem:[#allocation2]] %s1386_s6 }
   0x2   :  { %13 = vsyncpa [#allocation4], 0  ;;  %s1182_s26 = smov 0  }
   0x3 LB: > { %s213_s29 = sshll.u32 %s1381_s1, 4  ;;  %s911_s30 = sadd.s32 4294967295, %s1134_s26   ;;  %s1134_s26 = sphi %s1182_s26, %s19_s26   ;;  %s214_s29 = int_to_ptr.hbm [resolvable:$true] %s213_s29 }
   0x4   : > { %p913_p0 = scmp.ge.s32.totalorder %s1134_s26, 1  ;;  %p202_p1 = scmp.lt.s32.totalorder %s1134_s26, 3 }
   0x5   : > { %p1079_p2 = scmp.eq.s32.totalorder %s911_s30, 0  ;;  %s1136_s6 = smov [#allocation3]  }
   0x6   : > { %p203_p3 = pnand %p913_p0, %p202_p1  ;;  %s215_s8 = sshll.u32 %s1136_s6, 4  ;;  %s216_s8 = int_to_ptr.vmem [resolvable:$true] %s215_s8 }
   0x7   : > { %s1137_s9 = smov 128   ;;  %s1138_s10 = smov 8  }
   0x8   : > { %p1075_p4 = pneg %p203_p3  ;;  %255 = sbr.rel (%p203_p3) target bundleno = 528 (0x210), region = 48 }
   0xa   : > { %p1076_p5 = pnand %p1079_p2, %p1075_p4 }
   0xc   : > { %1078 = dma.hbm_to_vmem [thread:$0]  (!%p1076_p5), %s214_s29, 512, %s216_s8, [#allocation4], %s1137_s9, %s1137_s9, %s1138_s10  }
   0xd   : > { %1129 = dma.done.wait (%p1079_p2), [#allocation4], 512  }
   0xe   : > { %1131 = vsyncadd (%p1079_p2), [#allocation4], 4294966784  ;;  %s288_s11 = smul.u32 14, %s911_s30  ;;  %v958_v0 = vld [vmem:[#allocation3 + $0x10] sm:$0xf]  ;;  %vm380_vm0 = vcmask 261120  }
   0xf   : > { %v1054_v1 = vld [vmem:[#allocation3 + $0x14] sm:$0xf0]  ;;  %v1053_v2 = vld [vmem:[#allocation3 + $0x14] sm:$0xf]  ;;  %v960_v4 = vld [vmem:[#allocation3 + $0x18] sm:$0xf0] }
  0x10   : > { %p289_p6 = scmp.lt.s32.totalorder %s288_s11, 27  ;;  %v959_v3 = vor.u32 %v1054_v1, %v958_v0  ;;  %v950_v5 = vld [vmem:[#allocation3] sm:$0xf]  ;;  %v1052_v6 = vld [vmem:[#allocation3 + $0x4] sm:$0xf0]  ;;  %v963_v7 = vor.u32 %v1053_v2, %v960_v4  ;;  %v1062_v17 = vld [vmem:[%s1383_s3 + $0x38] sm:$0xff] }
  0x11   : > { %v1051_v8 = vld [vmem:[#allocation3 + $0x4] sm:$0xf]  ;;  %v952_v9 = vld [vmem:[#allocation3 + $0x8] sm:$0xf0]  ;;  %v951_v10 = vor.u32 %v1052_v6, %v950_v5  ;;  %v1070_v18 = vld [vmem:[%s1383_s3 + $0x78] sm:$0xff]  ;;  %664 = vmatpush.bf16.msra.mxu2 %v1062_v17  ;;  %s812_s9 = sld [smem:[#allocation2]] }
  0x12   : > { %s1389_s11 = smov (!%p289_p6, %s288_s11), 27  ;;  %408 = vmatpush.bf16.msra.mxu0 %v959_v3  ;;  %452 = vmatpush.bf16.msra.mxu1 %v963_v7  ;;  %v955_v11 = vor.u32 %v1051_v8, %v952_v9  ;;  %v1061_v19 = vld [vmem:[%s1383_s3 + $0x30] sm:$0xff]  ;;  %v1060_v21 = vld [vmem:[%s1383_s3 + $0x28] sm:$0xff]  ;;  %v1059_v23 = vld [vmem:[%s1383_s3 + $0x20] sm:$0xff]  ;;  %vm828_vm1 = vcmask 7168  }
  0x13   : > { %s918_s12 = sshll.u32 %s1389_s11, 2  ;;  %708 = vmatpush.bf16.msra.mxu3 %v1070_v18  ;;  %v1069_v20 = vld [vmem:[%s1383_s3 + $0x70] sm:$0xff]  ;;  %v1068_v22 = vld [vmem:[%s1383_s3 + $0x68] sm:$0xff]  ;;  %v1067_v24 = vld [vmem:[%s1383_s3 + $0x60] sm:$0xff]  ;;  %s919_s10 = sshll.u32 %s1389_s11, 3 }
  0x14   : > { %s1199_s15 = scalar_lea.vmem %s1380_s0, %s918_s12  ;;  %v1058_v27 = vld [vmem:[%s1383_s3 + $0x18] sm:$0xff]  ;;  %v1057_v29 = vld [vmem:[%s1383_s3 + $0x10] sm:$0xff]  ;;  %v1056_v31 = vld [vmem:[%s1383_s3 + $0x8] sm:$0xff]  ;;  %s1347_s14 = scalar_lea.vmem %s1387_s7, %s919_s10 }
  0x15   : > { %v1044_v12 = vld [vmem:[%s1199_s15] sm:$0xff]  ;;  %v1045_v13 = vld [vmem:[%s1199_s15 + $0x8] sm:$0xff]  ;;  %v1046_v14 = vld [vmem:[%s1199_s15 + $0x10] sm:$0xff]  ;;  %665 = vmatpush.bf16.msra.mxu2 %v1061_v19 }
  0x16   : > { %409 = vmatpush.bf16.msra.mxu0 %v951_v10  ;;  %453 = vmatpush.bf16.msra.mxu1 %v955_v11  ;;  %v1047_v15 = vld [vmem:[%s1199_s15 + $0x18] sm:$0xff]  ;;  %v1048_v16 = vld [vmem:[%s1199_s15 + $0x20] sm:$0xff]  ;;  %v1049_v25 = vld [vmem:[%s1199_s15 + $0x28] sm:$0xff] }
  0x17   : > { %709 = vmatpush.bf16.msra.mxu3 %v1069_v20  ;;  %v1050_v26 = vld [vmem:[%s1199_s15 + $0x30] sm:$0xff]  ;;  %v1066_v28 = vld [vmem:[%s1383_s3 + $0x58] sm:$0xff]  ;;  %v1064_v32 = vld [vmem:[%s1383_s3 + $0x48] sm:$0xff] }
  0x18   : > { %v1065_v30 = vld [vmem:[%s1383_s3 + $0x50] sm:$0xff]  ;;  %v1055_v33 = vld [vmem:[%s1383_s3] sm:$0xff] }
  0x19   : > { %964 = vmatmul.msk.bf16.vlgmr.msra.gmra.mxu0 %vm380_vm0, %v1044_v12  ;;  %971 = vmatmul.msk.bf16.vlgmr.msra.gmra.mxu1 %vm380_vm0, %v1044_v12  ;;  %v1063_v34 = vld [vmem:[%s1383_s3 + $0x40] sm:$0xff] }
  0x1a   : > { %666 = vmatpush.bf16.msra.mxu2 %v1060_v21  ;;  %v319_v35 = vld [vmem:[%s1382_s2] sm:$0x3] }
  0x1b   : > { %710 = vmatpush.bf16.msra.mxu3 %v1068_v22  ;;  %v1273_v38 = vperm.slane %v319_v35, 0  ;;  %v1275_v39 = vperm.slane %v319_v35, 1 }
  0x1e   : > { %667 = vmatpush.bf16.msra.mxu2 %v1059_v23 }
  0x1f   : > { %711 = vmatpush.bf16.msra.mxu3 %v1067_v24 }
  0x22   : > { %668 = vmatpush.bf16.msra.mxu2 %v1058_v27 }
  0x23   : > { %712 = vmatpush.bf16.msra.mxu3 %v1066_v28 }
  0x26   : > { %669 = vmatpush.bf16.msra.mxu2 %v1057_v29 }
  0x27   : > { %713 = vmatpush.bf16.msra.mxu3 %v1065_v30 }
  0x29   : > { %965 = vmatmul.msk.bf16.gmra.mxu0 %vm380_vm0, %v1045_v13  ;;  %972 = vmatmul.msk.bf16.gmra.mxu1 %vm380_vm0, %v1045_v13 }
  0x2a   : > { %670 = vmatpush.bf16.msra.mxu2 %v1056_v31 }
  0x2b   : > { %714 = vmatpush.bf16.msra.mxu3 %v1064_v32 }
  0x2e   : > { %671 = vmatpush.bf16.msra.mxu2 %v1055_v33 }
  0x2f   : > { %715 = vmatpush.bf16.msra.mxu3 %v1063_v34 }
  0x39   : > { %966 = vmatmul.msk.bf16.gmra.mxu0 %vm380_vm0, %v1046_v14  ;;  %973 = vmatmul.msk.bf16.gmra.mxu1 %vm380_vm0, %v1046_v14 }
  0x49   : > { %967 = vmatmul.msk.bf16.gmra.mxu0 %vm380_vm0, %v1047_v15  ;;  %974 = vmatmul.msk.bf16.gmra.mxu1 %vm380_vm0, %v1047_v15 }
  0x59   : > { %968 = vmatmul.msk.bf16.gmra.mxu0 %vm380_vm0, %v1048_v16  ;;  %975 = vmatmul.msk.bf16.gmra.mxu1 %vm380_vm0, %v1048_v16 }
  0x69   : > { %969 = vmatmul.msk.bf16.gmra.mxu0 %vm380_vm0, %v1049_v25  ;;  %976 = vmatmul.msk.bf16.gmra.mxu1 %vm380_vm0, %v1049_v25 }
  0x79   : > { %970 = vmatmul.msk.bf16.gmra.mxu0 %vm380_vm0, %v1050_v26  ;;  %977 = vmatmul.msk.bf16.gmra.mxu1 %vm380_vm0, %v1050_v26 }
  0x96   : > { %v411_v36 = vpop.f32.mrf.mxu0  ;;  %v455_v37 = vpop.f32.mrf.mxu1 }
  0x97   : > { %v412_v40 = vadd.f32 %v411_v36, %v1273_v38  ;;  %v456_v41 = vadd.f32 %v455_v37, %v1275_v39 }
  0x99   : > { %v490_v46 = vmax.f32 %v412_v40, 0.0  ;;  %v491_v48 = vmax.f32 %v456_v41, 0.0 }
  0x9e   : > { %v413_v42 = vpop.f32.mrf.mxu0  ;;  %v457_v44 = vpop.f32.mrf.mxu1 }
  0x9f   : > { %v414_v43 = vadd.f32 %v413_v42, %v1273_v38  ;;  %v458_v45 = vadd.f32 %v457_v44, %v1275_v39 }
  0xa1   : > { %v492_v47 = vmax.f32 %v414_v43, 0.0  ;;  %v493_v49 = vmax.f32 %v458_v45, 0.0 }
  0xa3   : > { %v518_v50 = vpack.c.bf16 %v492_v47, %v490_v46  ;;  %v519_v51 = vpack.c.bf16 %v493_v49, %v491_v48 }
  0xa5   : > { %672 = vmatmul.bf16.vlgmr.msra.gmra.mxu2 %v518_v50  ;;  %716 = vmatmul.bf16.vlgmr.msra.gmra.mxu3 %v519_v51 }
  0xa6   : > { %v416_v52 = vpop.f32.mrf.mxu0  ;;  %v460_v53 = vpop.f32.mrf.mxu1 }
  0xa7   : > { %v417_v54 = vadd.f32 %v416_v52, %v1273_v38  ;;  %v461_v55 = vadd.f32 %v460_v53, %v1275_v39 }
  0xa9   : > { %v494_v60 = vmax.f32 %v417_v54, 0.0  ;;  %v495_v62 = vmax.f32 %v461_v55, 0.0 }
  0xae   : > { %v418_v56 = vpop.f32.mrf.mxu0  ;;  %v462_v58 = vpop.f32.mrf.mxu1 }
  0xaf   : > { %v419_v57 = vadd.f32 %v418_v56, %v1273_v38  ;;  %v463_v59 = vadd.f32 %v462_v58, %v1275_v39 }
  0xb1   : > { %v496_v61 = vmax.f32 %v419_v57, 0.0  ;;  %v497_v63 = vmax.f32 %v463_v59, 0.0 }
  0xb3   : > { %v520_v0 = vpack.c.bf16 %v496_v61, %v494_v60  ;;  %v521_v1 = vpack.c.bf16 %v497_v63, %v495_v62 }
  0xb5   : > { %677 = vmatmul.bf16.gmra.mxu2 %v520_v0  ;;  %721 = vmatmul.bf16.gmra.mxu3 %v521_v1 }
  0xb6   : > { %v421_v2 = vpop.f32.mrf.mxu0  ;;  %v465_v3 = vpop.f32.mrf.mxu1 }
  0xb7   : > { %v422_v4 = vadd.f32 %v421_v2, %v1273_v38  ;;  %v466_v5 = vadd.f32 %v465_v3, %v1275_v39 }
  0xb9   : > { %v498_v10 = vmax.f32 %v422_v4, 0.0  ;;  %v499_v12 = vmax.f32 %v466_v5, 0.0 }
  0xbe   : > { %v423_v6 = vpop.f32.mrf.mxu0  ;;  %v467_v8 = vpop.f32.mrf.mxu1 }
  0xbf   : > { %v424_v7 = vadd.f32 %v423_v6, %v1273_v38  ;;  %v468_v9 = vadd.f32 %v467_v8, %v1275_v39 }
  0xc1   : > { %v500_v11 = vmax.f32 %v424_v7, 0.0  ;;  %v501_v13 = vmax.f32 %v468_v9, 0.0 }
  0xc3   : > { %v522_v14 = vpack.c.bf16 %v500_v11, %v498_v10  ;;  %v523_v15 = vpack.c.bf16 %v501_v13, %v499_v12  ;;  %v1308_v10 = vld [vmem:[%s1384_s4] ss:$0 sm:$0xff] }
  0xc5   : > { %682 = vmatmul.bf16.gmra.mxu2 %v522_v14  ;;  %726 = vmatmul.bf16.gmra.mxu3 %v523_v15 }
  0xc6   : > { %v426_v16 = vpop.f32.mrf.mxu0  ;;  %v470_v17 = vpop.f32.mrf.mxu1 }
  0xc7   : > { %v427_v18 = vadd.f32 %v426_v16, %v1273_v38  ;;  %v471_v19 = vadd.f32 %v470_v17, %v1275_v39 }
  0xc9   : > { %v502_v24 = vmax.f32 %v427_v18, 0.0  ;;  %v503_v26 = vmax.f32 %v471_v19, 0.0 }
  0xce   : > { %v428_v20 = vpop.f32.mrf.mxu0  ;;  %v472_v22 = vpop.f32.mrf.mxu1 }
  0xcf   : > { %v429_v21 = vadd.f32 %v428_v20, %v1273_v38  ;;  %v473_v23 = vadd.f32 %v472_v22, %v1275_v39 }
  0xd1   : > { %v504_v25 = vmax.f32 %v429_v21, 0.0  ;;  %v505_v27 = vmax.f32 %v473_v23, 0.0 }
  0xd3   : > { %v524_v28 = vpack.c.bf16 %v504_v25, %v502_v24  ;;  %v525_v29 = vpack.c.bf16 %v505_v27, %v503_v26 }
  0xd5   : > { %687 = vmatmul.bf16.gmra.mxu2 %v524_v28  ;;  %731 = vmatmul.bf16.gmra.mxu3 %v525_v29 }
  0xd6   : > { %v431_v30 = vpop.f32.mrf.mxu0  ;;  %v475_v31 = vpop.f32.mrf.mxu1 }
  0xd7   : > { %v432_v32 = vadd.f32 %v431_v30, %v1273_v38  ;;  %v476_v33 = vadd.f32 %v475_v31, %v1275_v39 }
  0xd9   : > { %v506_v40 = vmax.f32 %v432_v32, 0.0  ;;  %v507_v42 = vmax.f32 %v476_v33, 0.0 }
  0xde   : > { %v433_v34 = vpop.f32.mrf.mxu0  ;;  %v477_v36 = vpop.f32.mrf.mxu1 }
  0xdf   : > { %v434_v35 = vadd.f32 %v433_v34, %v1273_v38  ;;  %v478_v37 = vadd.f32 %v477_v36, %v1275_v39 }
  0xe1   : > { %v508_v41 = vmax.f32 %v434_v35, 0.0  ;;  %v509_v43 = vmax.f32 %v478_v37, 0.0 }
  0xe3   : > { %v526_v44 = vpack.c.bf16 %v508_v41, %v506_v40  ;;  %v527_v45 = vpack.c.bf16 %v509_v43, %v507_v42 }
  0xe5   : > { %692 = vmatmul.bf16.gmra.mxu2 %v526_v44  ;;  %736 = vmatmul.bf16.gmra.mxu3 %v527_v45 }
  0xe6   : > { %v436_v46 = vpop.f32.mrf.mxu0  ;;  %v480_v47 = vpop.f32.mrf.mxu1 }
  0xe7   : > { %v437_v48 = vadd.f32 %v436_v46, %v1273_v38  ;;  %v481_v49 = vadd.f32 %v480_v47, %v1275_v39 }
  0xe9   : > { %v510_v54 = vmax.f32 %v437_v48, 0.0  ;;  %v511_v56 = vmax.f32 %v481_v49, 0.0 }
  0xee   : > { %v438_v50 = vpop.f32.mrf.mxu0  ;;  %v482_v52 = vpop.f32.mrf.mxu1 }
  0xef   : > { %v439_v51 = vadd.f32 %v438_v50, %v1273_v38  ;;  %v483_v53 = vadd.f32 %v482_v52, %v1275_v39 }
  0xf1   : > { %v512_v55 = vmax.f32 %v439_v51, 0.0  ;;  %v513_v57 = vmax.f32 %v483_v53, 0.0 }
  0xf3   : > { %v528_v58 = vpack.c.bf16 %v512_v55, %v510_v54  ;;  %v529_v59 = vpack.c.bf16 %v513_v57, %v511_v56 }
  0xf5   : > { %697 = vmatmul.bf16.gmra.mxu2 %v528_v58  ;;  %741 = vmatmul.bf16.gmra.mxu3 %v529_v59 }
  0xf6   : > { %v441_v60 = vpop.f32.mrf.mxu0  ;;  %v485_v61 = vpop.f32.mrf.mxu1 }
  0xf7   : > { %v442_v62 = vadd.f32 %v441_v60, %v1273_v38  ;;  %v486_v63 = vadd.f32 %v485_v61, %v1275_v39 }
  0xf9   : > { %v514_v4 = vmax.f32 %v442_v62, 0.0  ;;  %v515_v6 = vmax.f32 %v486_v63, 0.0 }
  0xfe   : > { %v443_v0 = vpop.f32.mrf.mxu0  ;;  %v487_v2 = vpop.f32.mrf.mxu1 }
  0xff   : > { %v444_v1 = vadd.f32 %v443_v0, %v1273_v38  ;;  %v488_v3 = vadd.f32 %v487_v2, %v1275_v39  ;;  %v1314_v39 = vld [vmem:[%s1385_s5] ss:$0 sm:$0xff] }
 0x101   : > { %v516_v5 = vmax.f32 %v444_v1, 0.0  ;;  %v517_v7 = vmax.f32 %v488_v3, 0.0 }
 0x103   : > { %v530_v8 = vpack.c.bf16 %v516_v5, %v514_v4  ;;  %v531_v9 = vpack.c.bf16 %v517_v7, %v515_v6 }
 0x105   : > { %702 = vmatmul.bf16.gmra.mxu2 %v530_v8  ;;  %746 = vmatmul.bf16.gmra.mxu3 %v531_v9 }
 0x128   : > { %v673_v11 = vpop.f32.mrf.mxu2  ;;  %v717_v38 = vpop.f32.mrf.mxu3 }
 0x129   : > { %v674_v12 = vadd.f32 %v1308_v10, %v673_v11 }
 0x12b   : > { %v718_v13 = vadd.f32 %v717_v38, %v674_v12 }
 0x12d   : > { %v752_v14 = vmax.f32 %v718_v13, 0.0 }
 0x12f   : > { %v770_v15 = vmul.f32 %v1314_v39, %v752_v14 }
 0x130   : > { %v675_v16 = vpop.f32.mrf.mxu2  ;;  %v719_v18 = vpop.f32.mrf.mxu3 }
 0x131   : > { %v676_v17 = vadd.f32 %v1308_v10, %v675_v16  ;;  %784 = vadd.xlane.f32.xlu0 %v770_v15 }
 0x133   : > { %v720_v19 = vadd.f32 %v719_v18, %v676_v17 }
 0x135   : > { %v753_v20 = vmax.f32 %v720_v19, 0.0 }
 0x137   : > { %v771_v21 = vmul.f32 %v1314_v39, %v753_v20 }
 0x138   : > { %v678_v22 = vpop.f32.mrf.mxu2  ;;  %v722_v24 = vpop.f32.mrf.mxu3 }
 0x139   : > { %v679_v23 = vadd.f32 %v1308_v10, %v678_v22  ;;  %786 = vadd.xlane.f32.xlu0 %v771_v21 }
 0x13b   : > { %v723_v25 = vadd.f32 %v722_v24, %v679_v23 }
 0x13d   : > { %v754_v26 = vmax.f32 %v723_v25, 0.0 }
 0x13f   : > { %v772_v27 = vmul.f32 %v1314_v39, %v754_v26 }
 0x140   : > { %v680_v28 = vpop.f32.mrf.mxu2  ;;  %v724_v30 = vpop.f32.mrf.mxu3 }
 0x141   : > { %v681_v29 = vadd.f32 %v1308_v10, %v680_v28  ;;  %788 = vadd.xlane.f32.xlu1 %v772_v27 }
 0x143   : > { %v725_v31 = vadd.f32 %v724_v30, %v681_v29 }
 0x145   : > { %v755_v32 = vmax.f32 %v725_v31, 0.0 }
 0x147   : > { %v773_v33 = vmul.f32 %v1314_v39, %v755_v32  ;;  %v813_v32 = vstv %s812_s9 }
 0x148   : > { %v683_v34 = vpop.f32.mrf.mxu2  ;;  %v727_v36 = vpop.f32.mrf.mxu3 }
 0x149   : > { %v684_v35 = vadd.f32 %v1308_v10, %v683_v34  ;;  %790 = vadd.xlane.f32.xlu1 %v773_v33 }
 0x14b   : > { %v728_v37 = vadd.f32 %v727_v36, %v684_v35 }
 0x14d   : > { %v756_v40 = vmax.f32 %v728_v37, 0.0 }
 0x14f   : > { %v774_v41 = vmul.f32 %v1314_v39, %v756_v40 }
 0x150   : > { %v685_v42 = vpop.f32.mrf.mxu2  ;;  %v729_v44 = vpop.f32.mrf.mxu3 }
 0x151   : > { %v686_v43 = vadd.f32 %v1308_v10, %v685_v42  ;;  %792 = vadd.xlane.f32.xlu2 %v774_v41 }
 0x153   : > { %v730_v45 = vadd.f32 %v729_v44, %v686_v43 }
 0x155   : > { %v757_v46 = vmax.f32 %v730_v45, 0.0 }
 0x157   : > { %v775_v47 = vmul.f32 %v1314_v39, %v757_v46 }
 0x158   : > { %v688_v48 = vpop.f32.mrf.mxu2  ;;  %v732_v50 = vpop.f32.mrf.mxu3 }
 0x159   : > { %v689_v49 = vadd.f32 %v1308_v10, %v688_v48  ;;  %794 = vadd.xlane.f32.xlu2 %v775_v47 }
 0x15b   : > { %v733_v51 = vadd.f32 %v732_v50, %v689_v49 }
 0x15d   : > { %v758_v52 = vmax.f32 %v733_v51, 0.0 }
 0x15f   : > { %v776_v53 = vmul.f32 %v1314_v39, %v758_v52 }
 0x160   : > { %v690_v54 = vpop.f32.mrf.mxu2  ;;  %v734_v56 = vpop.f32.mrf.mxu3 }
 0x161   : > { %v691_v55 = vadd.f32 %v1308_v10, %v690_v54  ;;  %796 = vadd.xlane.f32.xlu0 %v776_v53 }
 0x163   : > { %v735_v57 = vadd.f32 %v734_v56, %v691_v55 }
 0x165   : > { %v759_v58 = vmax.f32 %v735_v57, 0.0 }
 0x167   : > { %v777_v59 = vmul.f32 %v1314_v39, %v759_v58 }
 0x168   : > { %v693_v60 = vpop.f32.mrf.mxu2  ;;  %v737_v62 = vpop.f32.mrf.mxu3 }
 0x169   : > { %v694_v61 = vadd.f32 %v1308_v10, %v693_v60  ;;  %798 = vadd.xlane.f32.xlu1 %v777_v59 }
 0x16b   : > { %v738_v63 = vadd.f32 %v737_v62, %v694_v61 }
 0x16d   : > { %v760_v0 = vmax.f32 %v738_v63, 0.0 }
 0x16f   : > { %v778_v1 = vmul.f32 %v1314_v39, %v760_v0 }
 0x170   : > { %v695_v2 = vpop.f32.mrf.mxu2  ;;  %v739_v4 = vpop.f32.mrf.mxu3 }
 0x171   : > { %v696_v3 = vadd.f32 %v1308_v10, %v695_v2  ;;  %800 = vadd.xlane.f32.xlu2 %v778_v1 }
 0x173   : > { %v740_v5 = vadd.f32 %v739_v4, %v696_v3 }
 0x175   : > { %v761_v6 = vmax.f32 %v740_v5, 0.0 }
 0x177   : > { %v779_v7 = vmul.f32 %v1314_v39, %v761_v6 }
 0x178   : > { %v698_v8 = vpop.f32.mrf.mxu2  ;;  %v742_v11 = vpop.f32.mrf.mxu3 }
 0x179   : > { %v699_v9 = vadd.f32 %v1308_v10, %v698_v8  ;;  %802 = vadd.xlane.f32.xlu0 %v779_v7 }
 0x17b   : > { %v743_v12 = vadd.f32 %v742_v11, %v699_v9 }
 0x17d   : > { %v762_v38 = vmax.f32 %v743_v12, 0.0 }
 0x17f   : > { %v780_v13 = vmul.f32 %v1314_v39, %v762_v38 }
 0x180   : > { %v700_v14 = vpop.f32.mrf.mxu2  ;;  %v744_v16 = vpop.f32.mrf.mxu3 }
 0x181   : > { %v701_v15 = vadd.f32 %v1308_v10, %v700_v14  ;;  %804 = vadd.xlane.f32.xlu1 %v780_v13 }
 0x183   : > { %v745_v17 = vadd.f32 %v744_v16, %v701_v15 }
 0x185   : > { %v763_v18 = vmax.f32 %v745_v17, 0.0 }
 0x187   : > { %v781_v19 = vmul.f32 %v1314_v39, %v763_v18 }
 0x188   : > { %v703_v20 = vpop.f32.mrf.mxu2  ;;  %v747_v22 = vpop.f32.mrf.mxu3 }
 0x189   : > { %v704_v21 = vadd.f32 %v1308_v10, %v703_v20  ;;  %806 = vadd.xlane.f32.xlu2 %v781_v19 }
 0x18b   : > { %v748_v23 = vadd.f32 %v747_v22, %v704_v21 }
 0x18d   : > { %v764_v24 = vmax.f32 %v748_v23, 0.0 }
 0x18f   : > { %v782_v25 = vmul.f32 %v1314_v39, %v764_v24 }
 0x190   : > { %v705_v26 = vpop.f32.mrf.mxu2  ;;  %v749_v28 = vpop.f32.mrf.mxu3 }
 0x191   : > { %v706_v27 = vadd.f32 %v1308_v10, %v705_v26  ;;  %808 = vadd.xlane.f32.xlu0 %v782_v25 }
 0x193   : > { %v750_v29 = vadd.f32 %v749_v28, %v706_v27 }
 0x195   : > { %v765_v30 = vmax.f32 %v750_v29, 0.0 }
 0x197   : > { %v783_v31 = vmul.f32 %v1314_v39, %v765_v30 }
 0x199   : > { %810 = vadd.xlane.f32.xlu1 %v783_v31 }
 0x1a4   : > { %v785_v10 = vpop.xlane.xlu0 %784 }
 0x1a5   : > { %v814_v33 = vadd.f32 %v813_v32, %v785_v10 }
 0x1a7   : > { %829 = vst.msk [vmem:[%s1347_s14] sm:$0xff] %vm828_vm1, %v814_v33 }
 0x1ac   : > { %v787_v39 = vpop.xlane.xlu0 %786 }
 0x1ad   : > { %v815_v34 = vadd.f32 %v813_v32, %v787_v39 }
 0x1af   : > { %830 = vst.msk [vmem:[%s1347_s14 + $0x8] sm:$0xff] %vm828_vm1, %v815_v34 }
 0x1b4   : > { %v789_v35 = vpop.xlane.xlu1 %788 }
 0x1b5   : > { %v816_v36 = vadd.f32 %v813_v32, %v789_v35 }
 0x1b7   : > { %831 = vst.msk [vmem:[%s1347_s14 + $0x10] sm:$0xff] %vm828_vm1, %v816_v36 }
 0x1bc   : > { %v791_v37 = vpop.xlane.xlu1 %790 }
 0x1bd   : > { %v817_v40 = vadd.f32 %v813_v32, %v791_v37 }
 0x1bf   : > { %832 = vst.msk [vmem:[%s1347_s14 + $0x18] sm:$0xff] %vm828_vm1, %v817_v40 }
 0x1c4   : > { %v793_v41 = vpop.xlane.xlu2 %792 }
 0x1c5   : > { %v818_v42 = vadd.f32 %v813_v32, %v793_v41 }
 0x1c7   : > { %833 = vst.msk [vmem:[%s1347_s14 + $0x20] sm:$0xff] %vm828_vm1, %v818_v42 }
 0x1cc   : > { %v795_v43 = vpop.xlane.xlu2 %794 }
 0x1cd   : > { %v819_v44 = vadd.f32 %v813_v32, %v795_v43 }
 0x1cf   : > { %834 = vst.msk [vmem:[%s1347_s14 + $0x28] sm:$0xff] %vm828_vm1, %v819_v44 }
 0x1d4   : > { %v797_v45 = vpop.xlane.xlu0 %796 }
 0x1d5   : > { %v820_v46 = vadd.f32 %v813_v32, %v797_v45 }
 0x1d7   : > { %835 = vst.msk [vmem:[%s1347_s14 + $0x30] sm:$0xff] %vm828_vm1, %v820_v46 }
 0x1dc   : > { %v799_v47 = vpop.xlane.xlu1 %798 }
 0x1dd   : > { %v821_v48 = vadd.f32 %v813_v32, %v799_v47 }
 0x1df   : > { %836 = vst.msk [vmem:[%s1347_s14 + $0x38] sm:$0xff] %vm828_vm1, %v821_v48 }
 0x1e4   : > { %v801_v49 = vpop.xlane.xlu2 %800 }
 0x1e5   : > { %v822_v50 = vadd.f32 %v813_v32, %v801_v49 }
 0x1e7   : > { %837 = vst.msk [vmem:[%s1347_s14 + $0x40] sm:$0xff] %vm828_vm1, %v822_v50 }
 0x1ec   : > { %v803_v51 = vpop.xlane.xlu0 %802 }
 0x1ed   : > { %v823_v52 = vadd.f32 %v813_v32, %v803_v51 }
 0x1ef   : > { %838 = vst.msk [vmem:[%s1347_s14 + $0x48] sm:$0xff] %vm828_vm1, %v823_v52 }
 0x1f4   : > { %v805_v53 = vpop.xlane.xlu1 %804 }
 0x1f5   : > { %v824_v54 = vadd.f32 %v813_v32, %v805_v53 }
 0x1f7   : > { %839 = vst.msk [vmem:[%s1347_s14 + $0x50] sm:$0xff] %vm828_vm1, %v824_v54 }
 0x1fc   : > { %v807_v55 = vpop.xlane.xlu2 %806 }
 0x1fd   : > { %v825_v56 = vadd.f32 %v813_v32, %v807_v55 }
 0x1ff   : > { %840 = vst.msk [vmem:[%s1347_s14 + $0x58] sm:$0xff] %vm828_vm1, %v825_v56 }
 0x204   : > { %v809_v57 = vpop.xlane.xlu0 %808 }
 0x205   : > { %v826_v58 = vadd.f32 %v813_v32, %v809_v57 }
 0x207   : > { %841 = vst.msk [vmem:[%s1347_s14 + $0x60] sm:$0xff] %vm828_vm1, %v826_v58 }
 0x20c   : > { %v811_v59 = vpop.xlane.xlu1 %810 }
 0x20d   : > { %v827_v60 = vadd.f32 %v813_v32, %v811_v59 }
 0x20f   : > { %842 = vst.msk [vmem:[%s1347_s14 + $0x68] sm:$0xff] %vm828_vm1, %v827_v60 }
 0x210 PF: > { %s19_s26 = sadd.s32 1, %s1134_s26  }
 0x211   : > { %p16_p7 = scmp.ge.s32.totalorder %s19_s26, 4  }
 0x213   :  { %18 = sbr.rel (!%p16_p7) target bundleno = 3 (0x3), region = 83 }
 0x218   :  { %865 = vsyncpa [#allocation4], 1 }
 0x219   :  { %867 = vsyncpa [#allocation4 + $0x1], 1 }

</bundles_post_ra>
